<compile_context>
chip_gen: v7x
topology: tpu7x:2x2x1
jax: 0.10.0
libtpu: 0.0.40
codegen_flags: <defaults>
</compile_context>

<pallas_src>
import functools

import jax
import jax.numpy as jnp
from jax.experimental import pallas as pl
from jax.experimental.pallas import tpu as pltpu

IN_DIM = 64
OUT_DIM = 2          # nn.Linear(in_dim, 2)
LINCLASS_COEFF = 1.0  # TODO(synk): hyp.linclass_coeff is external config; fixed to 1.0 here.


def _round_up(x, m):
    return ((x + m - 1) // m) * m


def _linclass_kernel(codes_ref, counts_ref, w_ref, b_ref, out_ref, acc_ref,
                     *, inv_obj, inv_bkg, coeff):
    """Fully fused forward over one block of codes.

    codes_ref : [BN, IN_DIM] f32 (VMEM)  block of codes (zero-padded rows OK)
    counts_ref: [2, BN]      f32 (VMEM)  row 0: obj occurrence counts, row 1: bkg
    w_ref     : [IN_DIM, 2]  f32 (VMEM)
    b_ref     : [1, 2]       f32 (VMEM)
    out_ref   : [4]          f32 (SMEM)  [total_loss, obj_acc, bkg_acc, bal_acc]
    acc_ref   : [2, 8]       f32 (VMEM scratch) group-sum accumulator
    """
    step = pl.program_id(0)

    @pl.when(step == 0)
    def _():
        acc_ref[...] = jnp.zeros_like(acc_ref)

    # ---- linear layer once over the whole block: [BN, 2] ----
    z = jnp.dot(codes_ref[...], w_ref[...],
                preferred_element_type=jnp.float32) + b_ref[...]

    # ---- BCEWithLogitsLoss pieces (numerically stable), both targets at once ----
    #   t=1: max(z,0) - z + log1p(exp(-|z|))      t=0: max(z,0) + log1p(exp(-|z|))
    base = jnp.maximum(z, 0.0) + jnp.log1p(jnp.exp(-jnp.abs(z)))

    # accuracy via sign test (== round(sigmoid(z)) except for 0 < z <~ 1.2e-7;
    # documented, practically negligible divergence from the reference)
    pos = (z > 0.0).astype(jnp.float32)
    neg = (z <= 0.0).astype(jnp.float32)

    # ---- single group reduction on the MXU: [2, BN] @ [BN, 8] -> [2, 8] ----
    # columns: [bce(t=1) | bce(t=0) | match(t=1) | match(t=0)], 2 lanes each.
    quant = jnp.concatenate([base - z, base, pos, neg], axis=1)          # [BN, 8]
    acc_ref[...] += jnp.dot(counts_ref[...], quant,
                            preferred_element_type=jnp.float32)         # [2, 8]

    @pl.when(step == pl.num_programs(0) - 1)
    def _():
        gs = acc_ref[...]                                                # [2, 8]
        obj_loss = jnp.sum(gs[0:1, 0:2]) * inv_obj   # mean over m_obj*2 elements
        bkg_loss = jnp.sum(gs[1:2, 2:4]) * inv_bkg
        obj_acc = jnp.sum(gs[0:1, 4:6]) * inv_obj
        bkg_acc = jnp.sum(gs[1:2, 6:8]) * inv_bkg
        # utils_misc.add_loss('linclass/bce_loss', 0.0, bal_loss, coeff)
        out_ref[0] = coeff * (obj_loss + bkg_loss)
        out_ref[1] = obj_acc
        out_ref[2] = bkg_acc
        out_ref[3] = 0.5 * (obj_acc + bkg_acc)


def linclassnet_forward(codes, obj_inds, bkg_inds, w, b, *, coeff=LINCLASS_COEFF):
    """Reproduces LinClassNet.forward. Returns (total_loss, obj_acc, bkg_acc, bal_acc)."""
    n, in_dim = codes.shape
    m_obj = obj_inds.shape[0]
    m_bkg = bkg_inds.shape[0]
    if m_obj == 0 or m_bkg == 0:
        raise ValueError("LinClassNet requires non-empty obj_inds and bkg_inds "
                         "(BCE mean over an empty group is undefined).")

    codes = codes.astype(jnp.float32)
    w = w.astype(jnp.float32)
    b2 = b.reshape(1, OUT_DIM).astype(jnp.float32)

    # Index data is control data: turn it into a dense per-group occurrence-count
    # matrix [2, N] on the (tiny) XLA side instead of shipping an [R,1] int32
    # tile into the kernel's vector path.  Duplicates are counted correctly.
    counts = jnp.stack([
        jnp.zeros((n,), jnp.float32).at[obj_inds].add(1.0),
        jnp.zeros((n,), jnp.float32).at[bkg_inds].add(1.0),
    ], axis=0)                                                           # [2, N]

    # ---- block N so VMEM usage is O(block*IN_DIM), not O(N*IN_DIM) ----
    n8 = _round_up(n, 8)
    block_n = min(n8, 512)
    n_pad = _round_up(n8, block_n)
    if n_pad != n:
        codes = jnp.pad(codes, ((0, n_pad - n), (0, 0)))     # zero rows -> finite logits
        counts = jnp.pad(counts, ((0, 0), (0, n_pad - n)))   # zero counts -> no contribution
    grid = (n_pad // block_n,)

    kernel = functools.partial(
        _linclass_kernel,
        inv_obj=1.0 / float(m_obj * OUT_DIM),   # BCE / torch.mean default reductions
        inv_bkg=1.0 / float(m_bkg * OUT_DIM),
        coeff=float(coeff),
    )

    cost = pl.CostEstimate(
        flops=2 * n_pad * in_dim * OUT_DIM + 2 * 2 * n_pad * 8 + 8 * n_pad * OUT_DIM,
        transcendentals=2 * n_pad * OUT_DIM,
        bytes_accessed=4 * (n_pad * in_dim + 2 * n_pad + in_dim * OUT_DIM + OUT_DIM + 4),
    )

    out = pl.pallas_call(
        kernel,
        out_shape=jax.ShapeDtypeStruct((4,), jnp.float32),
        grid_spec=pltpu.PrefetchScalarGridSpec(
            num_scalar_prefetch=0,
            grid=grid,
            in_specs=[
                pl.BlockSpec((block_n, in_dim), lambda i: (i, 0)),   # codes block
                pl.BlockSpec((2, block_n), lambda i: (0, i)),        # counts block
                pl.BlockSpec((in_dim, OUT_DIM), lambda i: (0, 0)),   # W (resident)
                pl.BlockSpec((1, OUT_DIM), lambda i: (0, 0)),        # b (resident)
            ],
            out_specs=pl.BlockSpec(memory_space=pltpu.MemorySpace.SMEM),
            scratch_shapes=[pltpu.VMEM((2, 8), jnp.float32)],
        ),
        compiler_params=pltpu.CompilerParams(
            dimension_semantics=("arbitrary",)),   # N-axis is a reduction
        cost_estimate=cost,
    )(codes, counts, w, b2)

    return out[0], out[1], out[2], out[3]


def init_linear_params(key, in_dim=IN_DIM, out_dim=OUT_DIM):
    """Deterministic init mimicking nn.Linear: U(-1/sqrt(in_dim), 1/sqrt(in_dim))."""
    k_w, k_b = jax.random.split(key)
    bound = 1.0 / jnp.sqrt(jnp.float32(in_dim))
    # stored as [in_dim, out_dim] so the kernel computes x @ W + b
    w = jax.random.uniform(k_w, (in_dim, out_dim), jnp.float32, -bound, bound)
    b = jax.random.uniform(k_b, (out_dim,), jnp.float32, -bound, bound)
    return w, b


def _reference_forward(codes, obj_inds, bkg_inds, w, b):
    """Pure-JAX reference mirroring the PyTorch module."""
    def bce_mean(z, t):
        return jnp.mean(jnp.maximum(z, 0.0) - z * t + jnp.log1p(jnp.exp(-jnp.abs(z))))

    ol = codes[obj_inds] @ w + b
    bl = codes[bkg_inds] @ w + b
    bal_loss = bce_mean(ol, 1.0) + bce_mean(bl, 0.0)
    obj_acc = jnp.mean((jnp.round(jax.nn.sigmoid(ol)) == 1.0).astype(jnp.float32))
    bkg_acc = jnp.mean((jnp.round(jax.nn.sigmoid(bl)) == 0.0).astype(jnp.float32))
    return (LINCLASS_COEFF * bal_loss, obj_acc, bkg_acc, 0.5 * (obj_acc + bkg_acc))


if __name__ == "__main__":
    key = jax.random.PRNGKey(0)
    k_codes, k_params = jax.random.split(key)

    N = 16                                   # number of codes
    codes = jax.random.normal(k_codes, (N, IN_DIM), jnp.float32)
    obj_inds = jnp.array([0, 2, 5, 7, 9, 11, 13, 15], jnp.int32)
    bkg_inds = jnp.array([1, 3, 4, 6, 8, 10, 12, 14], jnp.int32)

    w, b = init_linear_params(k_params)

    fwd = jax.jit(linclassnet_forward)
    total_loss, obj_acc, bkg_acc, bal_acc = fwd(codes, obj_inds, bkg_inds, w, b)
    jax.block_until_ready((total_loss, obj_acc, bkg_acc, bal_acc))

    # correctness check against pure-JAX reference
    ref = _reference_forward(codes, obj_inds, bkg_inds, w, b)
    for got, want in zip((total_loss, obj_acc, bkg_acc, bal_acc), ref):
        assert jnp.allclose(got, want, atol=1e-4, rtol=1e-4), (got, want)

    print("KERNEL_OK")
</pallas_src>

<mosaic_0001>
module attributes {stable_mosaic.version = 11 : i64} {
  func.func @_linclass_kernel(%arg0: i32, %arg1: memref<16x64xf32, #tpu.memory_space<vmem>>, %arg2: memref<2x16xf32, #tpu.memory_space<vmem>>, %arg3: memref<64x2xf32, #tpu.memory_space<vmem>>, %arg4: memref<1x2xf32, #tpu.memory_space<vmem>>, %arg5: memref<4xf32, #tpu.memory_space<smem>>, %arg6: memref<2x8xf32, #tpu.memory_space<vmem>>) attributes {dimension_semantics = [#tpu.dimension_semantics<arbitrary>], iteration_bounds = array<i64: 1>, scalar_prefetch = 0 : i64, scratch_operands = 1 : i64, tpu.core_type = #tpu.core_type<tc>, window_params = [{transform_indices = @transform_0, window_bounds = array<i64: 16, 64>}, {transform_indices = @transform_1, window_bounds = array<i64: 2, 16>}, {pipeline_mode = #tpu.pipeline_mode<synchronous>, transform_indices = @transform_2, window_bounds = array<i64: 64, 2>}, {pipeline_mode = #tpu.pipeline_mode<synchronous>, transform_indices = @transform_3, window_bounds = array<i64: 1, 2>}, {transform_indices = @transform_4, window_bounds = array<i64: 4>}]} {
    %c0_i32 = arith.constant 0 : i32
    %0 = arith.cmpi eq, %arg0, %c0_i32 : i32
    %1 = arith.extui %0 : i1 to i32
    %c0_i32_0 = arith.constant 0 : i32
    %2 = arith.cmpi ne, %1, %c0_i32_0 : i32
    scf.if %2 {
      %cst_19 = arith.constant 0.000000e+00 : f32
      %35 = vector.broadcast %cst_19 : f32 to vector<2x8xf32>
      %c0_20 = arith.constant 0 : index
      %c0_21 = arith.constant 0 : index
      %36 = vector.load %arg6[%c0_20, %c0_21] : memref<2x8xf32, #tpu.memory_space<vmem>>, vector<2x8xf32>
      tpu.vector_store %arg6[%c0_20, %c0_21], %35 {strides = array<i32>} : memref<2x8xf32, #tpu.memory_space<vmem>>, vector<2x8xf32>,
    } else {
    }
    %c0 = arith.constant 0 : index
    %c0_1 = arith.constant 0 : index
    %3 = vector.load %arg1[%c0, %c0_1] : memref<16x64xf32, #tpu.memory_space<vmem>>, vector<16x64xf32>
    %c0_2 = arith.constant 0 : index
    %c0_3 = arith.constant 0 : index
    %4 = vector.load %arg3[%c0_2, %c0_3] : memref<64x2xf32, #tpu.memory_space<vmem>>, vector<64x2xf32>
    %cst = arith.constant dense<0.000000e+00> : vector<16x2xf32>
    %5 = tpu.matmul %3, %4, %cst {dimension_numbers = #tpu.dot_dimension_numbers<[1], [0], [0], [1], [0, 0, 1, 1], [], []>} : vector<16x64xf32>, vector<64x2xf32>, vector<16x2xf32> -> vector<16x2xf32>
    %c0_4 = arith.constant 0 : index
    %c0_5 = arith.constant 0 : index
    %6 = vector.load %arg4[%c0_4, %c0_5] : memref<1x2xf32, #tpu.memory_space<vmem>>, vector<1x2xf32>
    %7 = vector.broadcast %6 : vector<1x2xf32> to vector<16x2xf32>
    %8 = arith.addf %5, %7 : vector<16x2xf32>
    %cst_6 = arith.constant 0.000000e+00 : f32
    %9 = vector.broadcast %cst_6 : f32 to vector<16x2xf32>
    %10 = arith.maximumf %8, %9 : vector<16x2xf32>
    %11 = math.absf %8 : vector<16x2xf32>
    %cst_7 = arith.constant 0.000000e+00 : f32
    %12 = vector.broadcast %cst_7 : f32 to vector<16x2xf32>
    %13 = arith.subf %12, %11 : vector<16x2xf32>
    %14 = math.exp %13 : vector<16x2xf32>
    %15 = math.log1p %14 : vector<16x2xf32>
    %16 = arith.addf %10, %15 : vector<16x2xf32>
    %cst_8 = arith.constant 0.000000e+00 : f32
    %17 = vector.broadcast %cst_8 : f32 to vector<16x2xf32>
    %18 = arith.cmpf ogt, %8, %17 : vector<16x2xf32>
    %19 = arith.extui %18 : vector<16x2xi1> to vector<16x2xi32>
    %20 = arith.sitofp %19 : vector<16x2xi32> to vector<16x2xf32>
    %cst_9 = arith.constant 0.000000e+00 : f32
    %21 = vector.broadcast %cst_9 : f32 to vector<16x2xf32>
    %22 = arith.cmpf ole, %8, %21 : vector<16x2xf32>
    %23 = arith.extui %22 : vector<16x2xi1> to vector<16x2xi32>
    %24 = arith.sitofp %23 : vector<16x2xi32> to vector<16x2xf32>
    %25 = arith.subf %16, %8 : vector<16x2xf32>
    %26 = tpu.concatenate %25, %16, %20, %24 in 1 : vector<16x2xf32>, vector<16x2xf32>, vector<16x2xf32>, vector<16x2xf32> -> vector<16x8xf32>
    %c0_10 = arith.constant 0 : index
    %c0_11 = arith.constant 0 : index
    %27 = vector.load %arg6[%c0_10, %c0_11] : memref<2x8xf32, #tpu.memory_space<vmem>>, vector<2x8xf32>
    %c0_12 = arith.constant 0 : index
    %c0_13 = arith.constant 0 : index
    %28 = vector.load %arg2[%c0_12, %c0_13] : memref<2x16xf32, #tpu.memory_space<vmem>>, vector<2x16xf32>
    %cst_14 = arith.constant dense<0.000000e+00> : vector<2x8xf32>
    %29 = tpu.matmul %28, %26, %cst_14 {dimension_numbers = #tpu.dot_dimension_numbers<[1], [0], [0], [1], [0, 0, 1, 1], [], []>} : vector<2x16xf32>, vector<16x8xf32>, vector<2x8xf32> -> vector<2x8xf32>
    %30 = arith.addf %27, %29 : vector<2x8xf32>
    %c0_15 = arith.constant 0 : index
    %c0_16 = arith.constant 0 : index
    %31 = vector.load %arg6[%c0_15, %c0_16] : memref<2x8xf32, #tpu.memory_space<vmem>>, vector<2x8xf32>
    tpu.vector_store %arg6[%c0_15, %c0_16], %30 {strides = array<i32>} : memref<2x8xf32, #tpu.memory_space<vmem>>, vector<2x8xf32>,
    %c0_i32_17 = arith.constant 0 : i32
    %32 = arith.cmpi eq, %arg0, %c0_i32_17 : i32
    %33 = arith.extui %32 : i1 to i32
    %c0_i32_18 = arith.constant 0 : i32
    %34 = arith.cmpi ne, %33, %c0_i32_18 : i32
    scf.if %34 {
      %c0_19 = arith.constant 0 : index
      %c0_20 = arith.constant 0 : index
      %35 = vector.load %arg6[%c0_19, %c0_20] : memref<2x8xf32, #tpu.memory_space<vmem>>, vector<2x8xf32>
      %36 = vector.extract_strided_slice %35 {offsets = [0, 0], sizes = [1, 2], strides = [1, 1]} : vector<2x8xf32> to vector<1x2xf32>
      %37 = vector.shape_cast %36 : vector<1x2xf32> to vector<1x1x2xf32>
      %cst_21 = arith.constant dense<0.000000e+00> : vector<1xf32>
      %38 = vector.multi_reduction <add>, %37, %cst_21 [1, 2] : vector<1x1x2xf32> to vector<1xf32>
      %39 = vector.shape_cast %38 : vector<1xf32> to vector<1x1x1xf32>
      %40 = vector.extract %39[0, 0, 0] : f32 from vector<1x1x1xf32>
      %cst_22 = arith.constant 6.250000e-02 : f32
      %41 = arith.mulf %40, %cst_22 : f32
      %42 = vector.extract_strided_slice %35 {offsets = [1, 2], sizes = [1, 2], strides = [1, 1]} : vector<2x8xf32> to vector<1x2xf32>
      %43 = vector.shape_cast %42 : vector<1x2xf32> to vector<1x1x2xf32>
      %cst_23 = arith.constant dense<0.000000e+00> : vector<1xf32>
      %44 = vector.multi_reduction <add>, %43, %cst_23 [1, 2] : vector<1x1x2xf32> to vector<1xf32>
      %45 = vector.shape_cast %44 : vector<1xf32> to vector<1x1x1xf32>
      %46 = vector.extract %45[0, 0, 0] : f32 from vector<1x1x1xf32>
      %cst_24 = arith.constant 6.250000e-02 : f32
      %47 = arith.mulf %46, %cst_24 : f32
      %48 = vector.extract_strided_slice %35 {offsets = [0, 4], sizes = [1, 2], strides = [1, 1]} : vector<2x8xf32> to vector<1x2xf32>
      %49 = vector.shape_cast %48 : vector<1x2xf32> to vector<1x1x2xf32>
      %cst_25 = arith.constant dense<0.000000e+00> : vector<1xf32>
      %50 = vector.multi_reduction <add>, %49, %cst_25 [1, 2] : vector<1x1x2xf32> to vector<1xf32>
      %51 = vector.shape_cast %50 : vector<1xf32> to vector<1x1x1xf32>
      %52 = vector.extract %51[0, 0, 0] : f32 from vector<1x1x1xf32>
      %cst_26 = arith.constant 6.250000e-02 : f32
      %53 = arith.mulf %52, %cst_26 : f32
      %54 = vector.extract_strided_slice %35 {offsets = [1, 6], sizes = [1, 2], strides = [1, 1]} : vector<2x8xf32> to vector<1x2xf32>
      %55 = vector.shape_cast %54 : vector<1x2xf32> to vector<1x1x2xf32>
      %cst_27 = arith.constant dense<0.000000e+00> : vector<1xf32>
      %56 = vector.multi_reduction <add>, %55, %cst_27 [1, 2] : vector<1x1x2xf32> to vector<1xf32>
      %57 = vector.shape_cast %56 : vector<1xf32> to vector<1x1x1xf32>
      %58 = vector.extract %57[0, 0, 0] : f32 from vector<1x1x1xf32>
      %cst_28 = arith.constant 6.250000e-02 : f32
      %59 = arith.mulf %58, %cst_28 : f32
      %60 = arith.addf %41, %47 : f32
      %cst_29 = arith.constant 1.000000e+00 : f32
      %61 = arith.mulf %cst_29, %60 : f32
      %c0_30 = arith.constant 0 : index
      %62 = memref.load %arg5[%c0_30] : memref<4xf32, #tpu.memory_space<smem>>
      memref.store %61, %arg5[%c0_30] : memref<4xf32, #tpu.memory_space<smem>>
      %c1 = arith.constant 1 : index
      %63 = memref.load %arg5[%c1] : memref<4xf32, #tpu.memory_space<smem>>
      memref.store %53, %arg5[%c1] : memref<4xf32, #tpu.memory_space<smem>>
      %c2 = arith.constant 2 : index
      %64 = memref.load %arg5[%c2] : memref<4xf32, #tpu.memory_space<smem>>
      memref.store %59, %arg5[%c2] : memref<4xf32, #tpu.memory_space<smem>>
      %65 = arith.addf %53, %59 : f32
      %cst_31 = arith.constant 5.000000e-01 : f32
      %66 = arith.mulf %cst_31, %65 : f32
      %c3 = arith.constant 3 : index
      %67 = memref.load %arg5[%c3] : memref<4xf32, #tpu.memory_space<smem>>
      memref.store %66, %arg5[%c3] : memref<4xf32, #tpu.memory_space<smem>>
    } else {
    }
    return
  }
  func.func @transform_0(%arg0: i32) -> (i32, i32) {
    %c0_i32 = arith.constant 0 : i32
    %c0_i32_0 = arith.constant 0 : i32
    return %arg0, %c0_i32 : i32, i32
  }
  func.func @transform_1(%arg0: i32) -> (i32, i32) {
    %c0_i32 = arith.constant 0 : i32
    %c0_i32_0 = arith.constant 0 : i32
    return %c0_i32, %arg0 : i32, i32
  }
  func.func @transform_2(%arg0: i32) -> (i32, i32) {
    %c0_i32 = arith.constant 0 : i32
    %c0_i32_0 = arith.constant 0 : i32
    %c0_i32_1 = arith.constant 0 : i32
    return %c0_i32, %c0_i32_0 : i32, i32
  }
  func.func @transform_3(%arg0: i32) -> (i32, i32) {
    %c0_i32 = arith.constant 0 : i32
    %c0_i32_0 = arith.constant 0 : i32
    %c0_i32_1 = arith.constant 0 : i32
    return %c0_i32, %c0_i32_0 : i32, i32
  }
  func.func @transform_4(%arg0: i32) -> i32 {
    %c0_i32 = arith.constant 0 : i32
    %c0_i32_0 = arith.constant 0 : i32
    return %c0_i32 : i32
  }
}

</mosaic_0001>

<bundles_post_ra>
// kernel: linclassnet_forward.1
= control target key start
LH: loop header
LB: loop body
LE: loop exit
PB: predicated region body
PF: predicated region fallthrough
CT: control target
= control target key end

     0   :  { %vm41_vm0 = vcmask 523264   ;;  %s578_s0 = inlined_call_operand.vmem [shape: f32[16,64], index: 0, kind: input, shape index: {}]   ;;  %s579_s1 = inlined_call_operand.vmem [shape: f32[2,16], index: 1, kind: input, shape index: {}]   ;;  %s580_s2 = inlined_call_operand.vmem [shape: f32[64,2], index: 2, kind: input, shape index: {}]   ;;  %s581_s3 = inlined_call_operand.vmem [shape: f32[1,2], index: 3, kind: input, shape index: {}]   ;;  %s582_s4 = inlined_call_operand.vmem [shape: f32[4], index: 4, kind: output, shape index: {}]  }
   0x1   :  { %v26_v0 = vld [vmem:[%s580_s2] sm:$0xff]  ;;  %v27_v1 = vld [vmem:[%s580_s2 + $0x8] sm:$0xff]  ;;  %v28_v2 = vld [vmem:[%s580_s2 + $0x10] sm:$0xff] }
   0x2   :  { %v412_v3 = vpack.c.bf16 %v27_v1, %v26_v0  ;;  %v29_v4 = vld [vmem:[%s580_s2 + $0x18] sm:$0xff]  ;;  %v30_v6 = vld [vmem:[%s580_s2 + $0x20] sm:$0xff]  ;;  %v31_v7 = vld [vmem:[%s580_s2 + $0x28] sm:$0xff] }
   0x3   :  { %v416_v5 = vpack.c.bf16 %v29_v4, %v28_v2  ;;  %v24_v8 = vld [vmem:[%s578_s0] sm:$0xff] }
   0x4   :  { %413 = vmatprep.subr.bf16.mxu0 %v412_v3  ;;  %402 = vmatprep.mubr.msk.f32.mxu0 %vm41_vm0, %v24_v8 }
   0x5   :  { %9 = vsyncpa [#allocation4], 0  ;;  %415 = vmatpush3.bf16.msra.mxu0 %v412_v3  ;;  %v420_v9 = vpack.c.bf16 %v31_v7, %v30_v6  ;;  %v32_v10 = vld [vmem:[%s580_s2 + $0x30] sm:$0xff]  ;;  %v33_v11 = vld [vmem:[%s580_s2 + $0x38] sm:$0xff]  ;;  %v486_v21 = vmov 0.0   ;;  %v488_v46 = vmov 0.0|0.0  }
   0x6   :  { %417 = vmatprep.subr.bf16.mxu0 %v416_v5  ;;  %v424_v12 = vpack.c.bf16 %v33_v11, %v32_v10  ;;  %v25_v13 = vld [vmem:[%s578_s0 + $0x8] sm:$0xff]  ;;  %v365_v14 = vld [vmem:[%s581_s3] ss:$0 sm:$0xff]  ;;  %s487_s0 = smov 6   ;;  %428 = vmatprep.subr.bf16.mxu1 %v488_v46  ;;  %vm489_vm7 = vmmov 0   ;;  %s490_s2 = smov 2  }
   0x7   :  { %409 = vmatprep.mubr.msk.f32.mxu1 %vm489_vm7, %v486_v21  ;;  %vm22_vm8 = vcmask 58368   ;;  %s491_s3 = smov 4   ;;  %vm191_vm9 = vcmask 15360   ;;  %vm194_vm10 = vcmask 31744   ;;  %vm197_vm11 = vcmask 48128   ;;  %s492_s13 = smov 124  }
   0x8   :  { %23 = vst.msk [vmem:[#allocation2] sm:$0x3] %vm22_vm8, %v486_v21  ;;  %v201_v10 = vld [vmem:[%s579_s1] sm:$0x3]  ;;  %vm202_vm12 = vcmask 130048   ;;  %s493_s14 = smov 126  }
   0x9   :  { %419 = vmatpush3.bf16.msra.mxu0 %v416_v5  ;;  %s494_s15 = smov 122   ;;  %vm283_vm13 = vcmask 8192   ;;  %s356_s26 = sshll.u32 %s582_s4, 4  ;;  %s357_s26 = int_to_ptr.vmem [resolvable:$true] %s356_s26 }
   0xa   :  { %421 = vmatprep.subr.bf16.mxu0 %v420_v9  ;;  %s472_s29 = scalar_lea.vmem %s357_s26, 16  ;;  %p477_p1 = scmp.lt.s32.totalorder %s357_s26, %s357_s26 }
   0xb   :  { %p473_p0 = scmp.ne.s32.totalorder %s357_s26, %s472_s29  ;;  %p478_p2 = scmp.lt.s32.totalorder %s472_s29, %s472_s29 }
   0xd   :  { %423 = vmatpush3.bf16.msra.mxu0 %v420_v9  ;;  %p479_p3 = por %p478_p2, %p477_p1 }
   0xe   :  { %425 = vmatprep.subr.bf16.mxu0 %v424_v12 }
   0xf   :  { %v200_v11 = vld [vmem:[#allocation2] sm:$0x3]  ;;  %p480_p4 = pnand %p479_p3, %p473_p0 }
  0x11   :  { %427 = vmatpush3.bf16.msra.mxu0 %v424_v12 }
  0x14   :  { %403 = vmatmul.mubr.msk.f32.vlgmr.msra.gmra.mrb[0].mxu0 %vm41_vm0, %v25_v13 }
  0xe7   :  { %v404_v15 = vpop.f32.mrb[0].mxu0 }
  0xe8   :  { %v556_v16 = vadd.f32 %v404_v15, %v365_v14  ;;  %v114_v17 = vpop.f32.mrb[1].mxu0 }
  0xe9   :  { %v558_v18 = vadd.f32 %v365_v14, %v114_v17 }
  0xea   :  { %v126_v19 = vand.u32 2147483647, %v556_v16  ;;  %vm160_vm1 = vcmp.le.f32.partialorder %v556_v16, 0.0  ;;  %vm154_vm2 = vcmp.gt.f32.partialorder %v556_v16, 0.0  ;;  %v124_v47 = vmax.f32 %v556_v16, 0.0 }
  0xeb   :  { %v125_v20 = vand.u32 2147483647, %v558_v18  ;;  %vm159_vm3 = vcmp.le.f32.partialorder %v558_v18, 0.0  ;;  %v371_v22 = vsel %vm160_vm1, 1.0, %v486_v21  ;;  %vm153_vm4 = vcmp.gt.f32.partialorder %v558_v18, 0.0 }
  0xec   :  { %v128_v23 = vsub.f32 0.0, %v126_v19  ;;  %v370_v24 = vsel %vm159_vm3, 1.0, %v486_v21  ;;  %v369_v25 = vsel %vm154_vm2, 1.0, %v486_v21  ;;  %v368_v28 = vsel %vm153_vm4, 1.0, %v486_v21 }
  0xed   :  { %v127_v26 = vsub.f32 0.0, %v125_v20  ;;  %v459_v27 = vpack.i.bf16 %v371_v22, %v370_v24  ;;  %v454_v30 = vpack.i.bf16 %v369_v25, %v368_v28  ;;  %v123_v50 = vmax.f32 %v558_v18, 0.0 }
  0xee   :  { %v131_v29 = vmul.f32 1.442695, %v128_v23 }
  0xef   :  { %v129_v31 = vmul.f32 1.442695, %v127_v26  ;;  %460 = vrot.lane.b32.xlu1 %v459_v27, %s487_s0 }
  0xf0   :  { %464 = vpow2.f32 %v131_v29 }
  0xf1   :  { %466 = vpow2.f32 %v129_v31 }
  0xfa   :  { %v465_v32 = vpop.eup %464 }
  0xfb   :  { %v467_v33 = vpop.eup %466  ;;  %v142_v34 = vadd.f32 1.0, %v465_v32  ;;  %v145_v36 = vmul.f32 -0.5, %v465_v32  ;;  %v148_v40 = vand.u32 2147483647, %v465_v32 }
  0xfc   :  { %v133_v35 = vadd.f32 1.0, %v467_v33  ;;  %v136_v37 = vmul.f32 -0.5, %v467_v33  ;;  %v139_v41 = vand.u32 2147483647, %v467_v33 }
  0xfd   :  { %468 = vlog2.f32 %v142_v34  ;;  %v146_v38 = vadd.f32 1.0, %v145_v36  ;;  %vm149_vm5 = vcmp.lt.f32.partialorder %v148_v40, 0.0004427343 }
  0xfe   :  { %470 = vlog2.f32 %v133_v35  ;;  %v137_v39 = vadd.f32 1.0, %v136_v37  ;;  %vm140_vm6 = vcmp.lt.f32.partialorder %v139_v41, 0.0004427343 }
  0xff   :  { %v147_v45 = vmul.f32 %v465_v32, %v146_v38 }
 0x100   :  { %v138_v49 = vmul.f32 %v467_v33, %v137_v39 }
 0x107   :  { %v469_v42 = vpop.eup %468 }
 0x108   :  { %v471_v43 = vpop.eup %470  ;;  %v144_v44 = vmul.f32 0.6931472, %v469_v42 }
 0x109   :  { %v135_v48 = vmul.f32 0.6931472, %v471_v43 }
 0x10a   :  { %v150_v51 = vsel %vm149_vm5, %v147_v45, %v144_v44 }
 0x10b   :  { %v141_v52 = vsel %vm140_vm6, %v138_v49, %v135_v48  ;;  %v152_v53 = vadd.f32 %v150_v51, %v124_v47 }
 0x10c   :  { %v151_v54 = vadd.f32 %v141_v52, %v123_v50 }
 0x10d   :  { %v166_v55 = vsub.f32 %v152_v53, %v556_v16 }
 0x10e   :  { %v449_v56 = vpack.i.bf16 %v152_v53, %v151_v54  ;;  %v165_v57 = vsub.f32 %v151_v54, %v558_v18 }
 0x110   :  { %450 = vrot.lane.b32.xlu0 %v449_v56, %s490_s2 }
 0x114   :  { %455 = vrot.lane.b32.xlu0 %v454_v30, %s491_s3 }
 0x161   :  { %v461_v61 = vpop.permute.xlu1 %460 }
 0x162   :  { %v463_v1 = vunpack.i.h.bf16 %v461_v61  ;;  %v462_v2 = vunpack.i.l.bf16 %v461_v61 }
 0x182   :  { %v451_v58 = vpop.permute.xlu0 %450 }
 0x183   :  { %v453_v59 = vunpack.i.h.bf16 %v451_v58  ;;  %v452_v60 = vunpack.i.l.bf16 %v451_v58 }
 0x185   :  { %v193_v3 = vsel %vm191_vm9, %v166_v55, %v453_v59  ;;  %v192_v4 = vsel %vm191_vm9, %v165_v57, %v452_v60 }
 0x186   :  { %v456_v62 = vpop.permute.xlu0 %455 }
 0x187   :  { %v458_v63 = vunpack.i.h.bf16 %v456_v62  ;;  %v457_v0 = vunpack.i.l.bf16 %v456_v62 }
 0x189   :  { %v195_v5 = vsel %vm194_vm10, %v192_v4, %v457_v0  ;;  %v196_v6 = vsel %vm194_vm10, %v193_v3, %v458_v63 }
 0x18a   :  { %v198_v7 = vsel %vm197_vm11, %v195_v5, %v462_v2  ;;  %v199_v8 = vsel %vm197_vm11, %v196_v6, %v463_v1 }
 0x18b   :  { %v429_v9 = vpack.c.bf16 %v199_v8, %v198_v7 }
 0x18d   :  { %430 = vmatpush3.bf16.msra.mxu1 %v429_v9 }
 0x190   :  { %410 = vmatmul.mubr.msk.f32.vlgmr.msra.gmra.mrb[0].mxu1 %vm202_vm12, %v201_v10 }
 0x263   :  { %v272_v12 = vpop.f32.mrb[0].mxu1 }
 0x264   :  { %v276_v13 = vadd.f32 %v272_v12, %v200_v11  ;;  %v411_v14 = vpop.f32.mrb[1].mxu1 }
 0x266   :  { %278 = vst.msk [vmem:[#allocation2] sm:$0x3] %vm22_vm8, %v276_v13 }
 0x26d   :  { %v282_v15 = vld [vmem:[#allocation2] sm:$0x3] }
 0x26e   :  { %311 = vrot.lane.b32.xlu0 %v282_v15, %s492_s13  ;;  %v296_v16 = vrot.slane %v282_v15, 1  ;;  %v284_v17 = vsel %vm283_vm13, %v282_v15, 0.0 }
 0x270   :  { %297 = vrot.lane.b32.xlu1 %v296_v16, %s493_s14 }
 0x274   :  { %325 = vrot.lane.b32.xlu1 %v296_v16, %s494_s15 }
 0x28d   :  { %285 = vadd.xlane.f32.xlu0 %v284_v17 }
 0x2e0   :  { %v312_v18 = vpop.permute.xlu0 %311 }
 0x2e1   :  { %v314_v19 = vsel %vm283_vm13, %v312_v18, 0.0 }
 0x2e2   :  { %v298_v20 = vpop.permute.xlu1 %297  ;;  %315 = vadd.xlane.f32.xlu0 %v314_v19 }
 0x2e3   :  { %v300_v21 = vsel %vm283_vm13, %v298_v20, 0.0 }
 0x2e4   :  { %301 = vadd.xlane.f32.xlu1 %v300_v21 }
 0x2e6   :  { %v326_v22 = vpop.permute.xlu1 %325 }
 0x2e7   :  { %v328_v23 = vsel %vm283_vm13, %v326_v22, 0.0 }
 0x2e8   :  { %329 = vadd.xlane.f32.xlu0 %v328_v23 }
 0x31a   :  { %v286_v24 = vpop.xlane.xlu0 %285 }
 0x31b   :  { %v287_v25 = vrot.slane %v286_v24, 4 }
 0x31d   :  { %v288_v26 = vadd.f32 %v287_v25, %v286_v24 }
 0x31f   :  { %v289_v27 = vrot.slane %v288_v26, 2 }
 0x321   :  { %v290_v28 = vadd.f32 %v289_v27, %v288_v26 }
 0x323   :  { %v291_v29 = vrot.slane %v290_v28, 1 }
 0x325   :  { %v292_v30 = vadd.f32 %v291_v29, %v290_v28 }
 0x327   :  { %431 = vpush %v292_v30 }
 0x358   :  { %s432_s1 = spop %431 }
 0x359   :  { %s294_s16 = smul.f32 0.0625, %s432_s1 }
 0x36f   :  { %v316_v31 = vpop.xlane.xlu0 %315 }
 0x370   :  { %v317_v32 = vrot.slane %v316_v31, 4 }
 0x371   :  { %v302_v33 = vpop.xlane.xlu1 %301 }
 0x372   :  { %v318_v34 = vadd.f32 %v317_v32, %v316_v31  ;;  %v303_v35 = vrot.slane %v302_v33, 4 }
 0x374   :  { %v319_v36 = vrot.slane %v318_v34, 2  ;;  %v304_v37 = vadd.f32 %v303_v35, %v302_v33 }
 0x375   :  { %v330_v38 = vpop.xlane.xlu0 %329 }
 0x376   :  { %v305_v39 = vrot.slane %v304_v37, 2  ;;  %v331_v40 = vrot.slane %v330_v38, 4  ;;  %v320_v41 = vadd.f32 %v319_v36, %v318_v34 }
 0x378   :  { %v306_v42 = vadd.f32 %v305_v39, %v304_v37  ;;  %v332_v43 = vadd.f32 %v331_v40, %v330_v38  ;;  %v321_v44 = vrot.slane %v320_v41, 1 }
 0x37a   :  { %v333_v45 = vrot.slane %v332_v43, 2  ;;  %v307_v46 = vrot.slane %v306_v42, 1  ;;  %v322_v49 = vadd.f32 %v321_v44, %v320_v41 }
 0x37c   :  { %v334_v47 = vadd.f32 %v333_v45, %v332_v43  ;;  %v308_v48 = vadd.f32 %v307_v46, %v306_v42 }
 0x37e   :  { %433 = vpush %v308_v48  ;;  %v335_v50 = vrot.slane %v334_v47, 1 }
 0x37f   :  { %435 = vpush %v322_v49 }
 0x380   :  { %v336_v51 = vadd.f32 %v335_v50, %v334_v47 }
 0x382   :  { %437 = vpush %v336_v51 }
 0x3af   :  { %s434_s17 = spop %433 }
 0x3b0   :  { %s310_s18 = smul.f32 0.0625, %s434_s17  ;;  %s436_s19 = spop %435 }
 0x3b1   :  { %s324_s20 = smul.f32 0.0625, %s436_s19 }
 0x3b2   :  { %s339_s21 = sadd.f32 %s310_s18, %s294_s16 }
 0x3b3   :  { %343 = sst [smem:[#allocation3 + $0x1]] %s324_s20  ;;  %s438_s22 = spop %437 }
 0x3b4   :  { %341 = sst [smem:[#allocation3]] %s339_s21  ;;  %s338_s23 = smul.f32 0.0625, %s438_s22 }
 0x3b6   :  { %345 = sst [smem:[#allocation3 + $0x2]] %s338_s23 }
 0x3b7   :  { %s346_s27 = sadd.f32 %s338_s23, %s324_s20 }
 0x3b9   :  { %s347_s28 = smul.f32 0.5, %s346_s27 }
 0x3bb   :  { %349 = sst [smem:[#allocation3 + $0x3]] %s347_s28 }
 0x3bc   :  { %483 = shalt.err (!%p480_p4)
}
 0x3bd   :  { %s495_s30 = smov [#allocation3]  }
 0x3be   :  { %359 = dma.smem_to_vmem %s495_s30, 16, %s357_s26, [#allocation4]  }
 0x3bf   :  { %484 = dma.done.wait [#allocation4], 16  }
 0x3c0   :  { %485 = vsyncadd [#allocation4], 4294967280 }
 0x3c1   :  { %363 = sfence }
 0x3c2   :  { %364 = vsyncpa [#allocation4], 1 }

</bundles_post_ra>
